<compile_context>
chip_gen: v7x
topology: tpu7x:2x2x1
jax: 0.10.0
libtpu: 0.0.40
codegen_flags: <defaults>
</compile_context>

<pallas_src>
import functools

import jax
import jax.numpy as jnp
from jax.experimental import pallas as pl
from jax.experimental.pallas import tpu as pltpu


def _round_up(x: int, m: int) -> int:
    return ((x + m - 1) // m) * m


def _lambda_kernel(h_ref, w_ref, b_ref, *rest, Z: int, softplus: bool, training: bool):
    if training:
        eps_ref, out_ref = rest
    else:
        (out_ref,) = rest

    # In-kernel cast to the MXU dtype (free under the DMA; avoids a wrapper copy).
    h = h_ref[...].astype(w_ref.dtype)            # [tm, H]
    w = w_ref[...]                                # [H, 2Z] (VMEM-resident)

    # Fused projection: one MXU pass -> [mean | logvar_raw], f32 accumulation.
    ml = jnp.dot(h, w, preferred_element_type=jnp.float32) + b_ref[...]

    mean = ml[:, :Z]
    logvar = ml[:, Z:]
    if softplus:
        logvar = jax.nn.softplus(logvar)          # f32 epilogue (EUP)

    if training:
        std = jnp.exp(0.5 * logvar)
        z = eps_ref[...].astype(jnp.float32) * std + mean   # reparameterization
        packed = jnp.concatenate([z, mean, logvar], axis=-1)
    else:
        packed = jnp.concatenate([mean, logvar], axis=-1)   # z == mean (eval)

    out_ref[...] = packed.astype(out_ref.dtype)


def pack_lambda_params(w_mean, b_mean, w_logvar, b_logvar, mxu_dtype=jnp.bfloat16):
    """Pack Lambda parameters ONCE at setup (not per forward call).

    w_mean/w_logvar: [H, Z] (transposed nn.Linear weights); b_*: [Z] or [1, Z].
    Returns (w_packed [H, 2Z] in mxu_dtype, b_packed [1, 2Z] in f32).
    """
    w_packed = jnp.concatenate([w_mean, w_logvar], axis=1).astype(mxu_dtype)
    b_packed = jnp.concatenate(
        [jnp.reshape(b_mean, (1, -1)), jnp.reshape(b_logvar, (1, -1))], axis=1
    ).astype(jnp.float32)
    return w_packed, b_packed


def lambda_forward(hidden, w_packed, b_packed, eps=None, *, softplus: bool = True,
                   training: bool = True, max_block_b: int = 2048, out_dtype=None):
    """Pallas forward of the VAME `Lambda` module.

    hidden:   [B, H]      (H = hidden_size_layer_1 * 4), any float dtype.
    w_packed: [H, 2Z]     (from pack_lambda_params)     b_packed: [1, 2Z]
    eps:      [B, Z]      standard-normal noise (required when training=True).

    Returns (z, mean, logvar), each [B, Z] in `out_dtype` (default hidden.dtype).
    """
    B, H = hidden.shape
    two_z = w_packed.shape[1]
    Z = two_z // 2
    out_dtype = out_dtype or hidden.dtype

    # Batch tile: multiple of 8 sublanes; big enough to dwarf the ~0.35 us/step
    # grid overhead, small enough to stay far under v7x's 64 MiB VMEM.
    sub = 8
    tm = min(_round_up(B, sub), _round_up(max_block_b, sub))
    if B >= 256:
        # Ensure >=2 parallel grid steps so both v7x TensorCores get work.
        tm = min(tm, _round_up(pl.cdiv(B, 2), sub))
    grid = (pl.cdiv(B, tm),)

    ncols = (3 if training else 2) * Z

    in_specs = [
        pl.BlockSpec((tm, H), lambda i: (i, 0)),          # hidden: tiled over batch
        pl.BlockSpec((H, two_z), lambda i: (0, 0)),       # fused weight: VMEM-resident
        pl.BlockSpec((1, two_z), lambda i: (0, 0)),       # fused bias:   VMEM-resident
    ]
    args = [hidden, w_packed, b_packed]
    if training:
        if eps is None:
            raise ValueError("eps is required when training=True")
        in_specs.append(pl.BlockSpec((tm, Z), lambda i: (i, 0)))
        args.append(eps)

    # Explicit VMEM budget (double-buffered streams + resident params), clamped to
    # a value that is safe on all generations (v5e default scoped = 16 MiB,
    # v7x physical = 64 MiB with 32 MiB default scoped limit).
    in_b = jnp.dtype(hidden.dtype).itemsize
    out_b = jnp.dtype(out_dtype).itemsize
    eps_b = jnp.dtype(eps.dtype).itemsize if training else 0
    vmem_est = (2 * (tm * H * in_b + tm * ncols * out_b + tm * Z * eps_b)
                + H * two_z * jnp.dtype(w_packed.dtype).itemsize
                + two_z * 4 + (2 << 20))
    vmem_limit = int(min(max(vmem_est, 16 << 20), 32 << 20))

    out = pl.pallas_call(
        functools.partial(_lambda_kernel, Z=Z, softplus=softplus, training=training),
        out_shape=jax.ShapeDtypeStruct((B, ncols), out_dtype),
        grid=grid,
        in_specs=in_specs,
        out_specs=pl.BlockSpec((tm, ncols), lambda i: (i, 0)),
        compiler_params=pltpu.CompilerParams(
            dimension_semantics=("parallel",),
            vmem_limit_bytes=vmem_limit,
        ),
    )(*args)

    if training:
        z = out[:, 0:Z]
        mean = out[:, Z:2 * Z]
        logvar = out[:, 2 * Z:3 * Z]
    else:
        mean = out[:, 0:Z]
        logvar = out[:, Z:2 * Z]
        z = mean                                   # eval: z aliases mean (PyTorch semantics)
    return z, mean, logvar


def _init_linear(key, in_dim, out_dim, dtype=jnp.float32):
    # Mimics PyTorch nn.Linear default init (uniform +/- 1/sqrt(fan_in)).
    kw, kb = jax.random.split(key)
    bound = 1.0 / jnp.sqrt(in_dim)
    w = jax.random.uniform(kw, (in_dim, out_dim), dtype, minval=-bound, maxval=bound)
    b = jax.random.uniform(kb, (1, out_dim), dtype, minval=-bound, maxval=bound)
    return w, b


def _reference(hidden, w_mean, b_mean, w_logvar, b_logvar, eps, softplus):
    mean = hidden @ w_mean + b_mean
    logvar = hidden @ w_logvar + b_logvar
    if softplus:
        logvar = jax.nn.softplus(logvar)
    z = eps * jnp.exp(0.5 * logvar) + mean
    return z, mean, logvar


if __name__ == "__main__":
    # Module config: ZDIMS=16, hidden_size_layer_1=32 -> hid_dim = 128
    ZDIMS = 16
    hidden_size_layer_1 = 32
    hid_dim = hidden_size_layer_1 * 4
    softplus = True

    key = jax.random.PRNGKey(0)
    k_h, k_m, k_l, k_eps, k_h2, k_e2 = jax.random.split(key, 6)

    w_mean, b_mean = _init_linear(k_m, hid_dim, ZDIMS)
    w_logvar, b_logvar = _init_linear(k_l, hid_dim, ZDIMS)
    # Parameter packing done ONCE at setup (hoisted out of the forward path).
    w_packed, b_packed = pack_lambda_params(w_mean, b_mean, w_logvar, b_logvar)

    # ---- small batch, training mode (reparameterization path) ----
    B = 8
    hidden = jax.random.normal(k_h, (B, hid_dim), jnp.float32)
    eps = jax.random.normal(k_eps, (B, ZDIMS), jnp.float32)

    z, mean, logvar = lambda_forward(hidden, w_packed, b_packed, eps,
                                     softplus=softplus, training=True)
    jax.block_until_ready((z, mean, logvar))

    z_ref, mean_ref, lv_ref = _reference(hidden, w_mean, b_mean, w_logvar,
                                         b_logvar, eps, softplus)
    # bf16 MXU inputs with f32 accumulation -> loose tolerance vs f32 reference.
    assert jnp.allclose(mean, mean_ref, atol=3e-2, rtol=3e-2)
    assert jnp.allclose(logvar, lv_ref, atol=3e-2, rtol=3e-2)
    assert jnp.allclose(z, z_ref, atol=5e-2, rtol=5e-2)

    # ---- small batch, inference mode (no eps input; z aliases mean) ----
    z_i, mean_i, logvar_i = lambda_forward(hidden, w_packed, b_packed,
                                           softplus=softplus, training=False)
    jax.block_until_ready((z_i, mean_i, logvar_i))
    assert jnp.allclose(mean_i, mean_ref, atol=3e-2, rtol=3e-2)
    assert jnp.allclose(logvar_i, lv_ref, atol=3e-2, rtol=3e-2)
    assert jnp.allclose(z_i, mean_i)

    # ---- larger batch: exercises >=2 grid steps + a partial last block (no pad) ----
    B2 = 300
    hidden2 = jax.random.normal(k_h2, (B2, hid_dim), jnp.float32)
    eps2 = jax.random.normal(k_e2, (B2, ZDIMS), jnp.float32)
    z2, mean2, logvar2 = lambda_forward(hidden2, w_packed, b_packed, eps2,
                                        softplus=softplus, training=True)
    jax.block_until_ready((z2, mean2, logvar2))
    z2_ref, mean2_ref, lv2_ref = _reference(hidden2, w_mean, b_mean, w_logvar,
                                            b_logvar, eps2, softplus)
    assert jnp.allclose(mean2, mean2_ref, atol=3e-2, rtol=3e-2)
    assert jnp.allclose(logvar2, lv2_ref, atol=3e-2, rtol=3e-2)
    assert jnp.allclose(z2, z2_ref, atol=5e-2, rtol=5e-2)

    print("KERNEL_OK")
</pallas_src>

<mosaic_0001>
module attributes {stable_mosaic.version = 11 : i64} {
  func.func @_lambda_kernel(%arg0: i32, %arg1: memref<8x128xf32, #tpu.memory_space<vmem>>, %arg2: memref<128x32xbf16, #tpu.memory_space<vmem>>, %arg3: memref<1x32xf32, #tpu.memory_space<vmem>>, %arg4: memref<8x16xf32, #tpu.memory_space<vmem>>, %arg5: memref<8x48xf32, #tpu.memory_space<vmem>>) attributes {dimension_semantics = [#tpu.dimension_semantics<parallel>], iteration_bounds = array<i64: 1>, scalar_prefetch = 0 : i64, scratch_operands = 0 : i64, tpu.core_type = #tpu.core_type<tc>, window_params = [{transform_indices = @transform_0, window_bounds = array<i64: 8, 128>}, {pipeline_mode = #tpu.pipeline_mode<synchronous>, transform_indices = @transform_1, window_bounds = array<i64: 128, 32>}, {pipeline_mode = #tpu.pipeline_mode<synchronous>, transform_indices = @transform_2, window_bounds = array<i64: 1, 32>}, {transform_indices = @transform_3, window_bounds = array<i64: 8, 16>}, {transform_indices = @transform_4, window_bounds = array<i64: 8, 48>}]} {
    %c0 = arith.constant 0 : index
    %c0_0 = arith.constant 0 : index
    %0 = vector.load %arg1[%c0, %c0_0] : memref<8x128xf32, #tpu.memory_space<vmem>>, vector<8x128xf32>
    %1 = arith.truncf %0 : vector<8x128xf32> to vector<8x128xbf16>
    %c0_1 = arith.constant 0 : index
    %c0_2 = arith.constant 0 : index
    %2 = vector.load %arg2[%c0_1, %c0_2] : memref<128x32xbf16, #tpu.memory_space<vmem>>, vector<128x32xbf16>
    %cst = arith.constant dense<0.000000e+00> : vector<8x32xf32>
    %3 = tpu.matmul %1, %2, %cst {dimension_numbers = #tpu.dot_dimension_numbers<[1], [0], [0], [1], [0, 0, 1, 1], [], []>} : vector<8x128xbf16>, vector<128x32xbf16>, vector<8x32xf32> -> vector<8x32xf32>
    %c0_3 = arith.constant 0 : index
    %c0_4 = arith.constant 0 : index
    %4 = vector.load %arg3[%c0_3, %c0_4] : memref<1x32xf32, #tpu.memory_space<vmem>>, vector<1x32xf32>
    %5 = vector.broadcast %4 : vector<1x32xf32> to vector<8x32xf32>
    %6 = arith.addf %3, %5 : vector<8x32xf32>
    %7 = vector.extract_strided_slice %6 {offsets = [0, 0], sizes = [8, 16], strides = [1, 1]} : vector<8x32xf32> to vector<8x16xf32>
    %8 = vector.extract_strided_slice %6 {offsets = [0, 16], sizes = [8, 16], strides = [1, 1]} : vector<8x32xf32> to vector<8x16xf32>
    %cst_5 = arith.constant 0.000000e+00 : f32
    %9 = vector.broadcast %cst_5 : f32 to vector<8x16xf32>
    %10 = arith.maximumf %8, %9 : vector<8x16xf32>
    %11 = vector.broadcast %cst_5 : f32 to vector<8x16xf32>
    %12 = arith.subf %8, %11 : vector<8x16xf32>
    %13 = arith.cmpf one, %12, %12 : vector<8x16xf32>
    %14 = vector.broadcast %cst_5 : f32 to vector<8x16xf32>
    %15 = arith.addf %8, %14 : vector<8x16xf32>
    %16 = math.absf %12 : vector<8x16xf32>
    %cst_6 = arith.constant 0.000000e+00 : f32
    %17 = vector.broadcast %cst_6 : f32 to vector<8x16xf32>
    %18 = arith.subf %17, %16 : vector<8x16xf32>
    %19 = math.exp %18 : vector<8x16xf32>
    %20 = math.log1p %19 : vector<8x16xf32>
    %21 = arith.addf %10, %20 : vector<8x16xf32>
    %22 = arith.select %13, %15, %21 : vector<8x16xi1>, vector<8x16xf32>
    %cst_7 = arith.constant 5.000000e-01 : f32
    %23 = vector.broadcast %cst_7 : f32 to vector<8x16xf32>
    %24 = arith.mulf %23, %22 : vector<8x16xf32>
    %25 = math.exp %24 : vector<8x16xf32>
    %c0_8 = arith.constant 0 : index
    %c0_9 = arith.constant 0 : index
    %26 = vector.load %arg4[%c0_8, %c0_9] : memref<8x16xf32, #tpu.memory_space<vmem>>, vector<8x16xf32>
    %27 = arith.mulf %26, %25 : vector<8x16xf32>
    %28 = arith.addf %27, %7 : vector<8x16xf32>
    %29 = tpu.concatenate %28, %7, %22 in 1 : vector<8x16xf32>, vector<8x16xf32>, vector<8x16xf32> -> vector<8x48xf32>
    %c0_10 = arith.constant 0 : index
    %c0_11 = arith.constant 0 : index
    %30 = vector.load %arg5[%c0_10, %c0_11] : memref<8x48xf32, #tpu.memory_space<vmem>>, vector<8x48xf32>
    tpu.vector_store %arg5[%c0_10, %c0_11], %29 {strides = array<i32>} : memref<8x48xf32, #tpu.memory_space<vmem>>, vector<8x48xf32>,
    return
  }
  func.func @transform_0(%arg0: i32) -> (i32, i32) {
    %c0_i32 = arith.constant 0 : i32
    %c0_i32_0 = arith.constant 0 : i32
    return %arg0, %c0_i32 : i32, i32
  }
  func.func @transform_1(%arg0: i32) -> (i32, i32) {
    %c0_i32 = arith.constant 0 : i32
    %c0_i32_0 = arith.constant 0 : i32
    %c0_i32_1 = arith.constant 0 : i32
    return %c0_i32, %c0_i32_0 : i32, i32
  }
  func.func @transform_2(%arg0: i32) -> (i32, i32) {
    %c0_i32 = arith.constant 0 : i32
    %c0_i32_0 = arith.constant 0 : i32
    %c0_i32_1 = arith.constant 0 : i32
    return %c0_i32, %c0_i32_0 : i32, i32
  }
  func.func @transform_3(%arg0: i32) -> (i32, i32) {
    %c0_i32 = arith.constant 0 : i32
    %c0_i32_0 = arith.constant 0 : i32
    return %arg0, %c0_i32 : i32, i32
  }
  func.func @transform_4(%arg0: i32) -> (i32, i32) {
    %c0_i32 = arith.constant 0 : i32
    %c0_i32_0 = arith.constant 0 : i32
    return %arg0, %c0_i32 : i32, i32
  }
}

</mosaic_0001>

<bundles_post_ra>
// kernel: tpu_custom_call.1
= control target key start
LH: loop header
LB: loop body
LE: loop exit
PB: predicated region body
PF: predicated region fallthrough
CT: control target
= control target key end

     0   :  { %v269_v1 = vmov 0.0   ;;  %vm270_vm0 = vmmov 0   ;;  %s344_s0 = inlined_call_operand.vmem [shape: f32[8,128], index: 0, kind: input, shape index: {}]   ;;  %s345_s1 = inlined_call_operand.vmem [shape: bf16[128,32], index: 1, kind: input, shape index: {}]   ;;  %s346_s2 = inlined_call_operand.vmem [shape: f32[1,32], index: 2, kind: input, shape index: {}]   ;;  %s347_s3 = inlined_call_operand.vmem [shape: f32[8,16], index: 3, kind: input, shape index: {}]   ;;  %s348_s4 = inlined_call_operand.hbm [shape: f32[8,48], index: 4, kind: output, shape index: {}]  }
   0x1   :  { %v231_v0 = vld [vmem:[%s345_s1] sm:$0xff]   ;;  %206 = vmatprep.subr.bf16.mxu0 %v269_v1  ;;  %v232_v2 = vld [vmem:[%s345_s1 + $0x8] sm:$0xff]   ;;  %222 = vmatprep.mubr.msk.bf16.mxu0 %vm270_vm0, %v269_v1  ;;  %v233_v3 = vld [vmem:[%s345_s1 + $0x10] sm:$0xff]  }
   0x2   :  { %207 = vmatpush3.bf16.msra.mxu0 %v231_v0 }
   0x3   :  { %208 = vmatprep.subr.bf16.mxu0 %v269_v1 }
   0x6   :  { %209 = vmatpush3.bf16.msra.mxu0 %v232_v2 }
   0x7   :  { %210 = vmatprep.subr.bf16.mxu0 %v269_v1 }
   0x8   :  { %9 = vsyncpa [#allocation3], 0  ;;  %v234_v4 = vld [vmem:[%s345_s1 + $0x18] sm:$0xff]   ;;  %v235_v5 = vld [vmem:[%s345_s1 + $0x20] sm:$0xff]   ;;  %vm168_vm3 = vcmask 130048   ;;  %s273_s10 = smov [#allocation2]  }
   0x9   :  { %v236_v6 = vld [vmem:[%s345_s1 + $0x28] sm:$0xff]   ;;  %v237_v7 = vld [vmem:[%s345_s1 + $0x30] sm:$0xff]   ;;  %v238_v8 = vld [vmem:[%s345_s1 + $0x38] sm:$0xff]   ;;  %s272_s1 = smov 112   ;;  %s180_s11 = sshll.u32 %s273_s10, 4  ;;  %vm170_vm4 = vcmask 261120   ;;  %s181_s11 = int_to_ptr.vmem [resolvable:$true] %s180_s11 }
   0xa   :  { %211 = vmatpush3.bf16.msra.mxu0 %v233_v3  ;;  %v19_v9 = vld [vmem:[%s344_s0] sm:$0xff]  ;;  %s271_s0 = smov 16   ;;  %vm172_vm5 = vcmask 392192   ;;  %s245_s12 = scalar_lea.vmem %s181_s11, 128 }
   0xb   :  { %212 = vmatprep.subr.bf16.mxu0 %v269_v1  ;;  %v20_v10 = vpack.c.bf16 %v19_v9, %v19_v9  ;;  %v188_v11 = vld [vmem:[%s346_s2] ss:$0 sm:$0xff]  ;;  %p246_p0 = scmp.ne.s32.totalorder %s181_s11, %s245_s12  ;;  %p250_p1 = scmp.lt.s32.totalorder %s181_s11, %s181_s11 }
   0xc   :  { %v153_v35 = vld [vmem:[%s347_s3] sm:$0xff]  ;;  %p251_p2 = scmp.lt.s32.totalorder %s245_s12, %s245_s12 }
   0xe   :  { %213 = vmatpush3.bf16.msra.mxu0 %v234_v4  ;;  %p252_p3 = por %p251_p2, %p250_p1 }
   0xf   :  { %214 = vmatprep.subr.bf16.mxu0 %v269_v1 }
  0x10   :  { %p253_p4 = pnand %p252_p3, %p246_p0 }
  0x12   :  { %215 = vmatpush3.bf16.msra.mxu0 %v235_v5 }
  0x13   :  { %216 = vmatprep.subr.bf16.mxu0 %v269_v1 }
  0x16   :  { %217 = vmatpush3.bf16.msra.mxu0 %v236_v6 }
  0x17   :  { %218 = vmatprep.subr.bf16.mxu0 %v269_v1 }
  0x1a   :  { %219 = vmatpush3.bf16.msra.mxu0 %v237_v7 }
  0x1b   :  { %220 = vmatprep.subr.bf16.mxu0 %v269_v1 }
  0x1e   :  { %221 = vmatpush3.bf16.msra.mxu0 %v238_v8 }
  0x21   :  { %223 = vmatmul.mubr.bf16.vlgmr.msra.gmra.mrb[0].mxu0 %v20_v10 }
  0xf4   :  { %v126_v12 = vpop.f32.mrb[0].mxu0 }
  0xf5   :  { %v127_v13 = vadd.f32 %v188_v11, %v126_v12  ;;  %v224_v14 = vpop.f32.mrb[1].mxu0 }
  0xf6   :  { %v129_v15 = vpop.f32.mrb[2].mxu0 }
  0xf7   :  { %v135_v16 = vand.u32 2147483647, %v127_v13  ;;  %v225_v17 = vpop.f32.mrb[3].mxu0  ;;  %v132_v28 = vmax.f32 %v127_v13, 0.0  ;;  %vm133_vm2 = vcmp.ne.f32.partialorder %v127_v13, %v127_v13 }
  0xf9   :  { %v136_v18 = vsub.f32 0.0, %v135_v16 }
  0xfb   :  { %v137_v19 = vmul.f32 1.442695, %v136_v18 }
  0xfd   :  { %239 = vpow2.f32 %v137_v19 }
 0x107   :  { %v240_v20 = vpop.eup %239 }
 0x108   :  { %v139_v21 = vadd.f32 1.0, %v240_v20  ;;  %v142_v22 = vmul.f32 -0.5, %v240_v20  ;;  %v145_v24 = vand.u32 2147483647, %v240_v20 }
 0x10a   :  { %241 = vlog2.f32 %v139_v21  ;;  %v143_v23 = vadd.f32 1.0, %v142_v22  ;;  %vm146_vm1 = vcmp.lt.f32.partialorder %v145_v24, 0.0004427343 }
 0x10c   :  { %v144_v27 = vmul.f32 %v240_v20, %v143_v23 }
 0x114   :  { %v242_v25 = vpop.eup %241 }
 0x115   :  { %v141_v26 = vmul.f32 0.6931472, %v242_v25 }
 0x117   :  { %v147_v29 = vsel %vm146_vm1, %v144_v27, %v141_v26 }
 0x118   :  { %v148_v30 = vadd.f32 %v147_v29, %v132_v28 }
 0x11a   :  { %v149_v31 = vsel %vm133_vm2, %v127_v13, %v148_v30 }
 0x11b   :  { %165 = vrot.lane.b32.xlu1 %v149_v31, %s271_s0  ;;  %v150_v32 = vmul.f32 0.5, %v149_v31 }
 0x11d   :  { %v151_v33 = vmul.f32 1.442695, %v150_v32 }
 0x11f   :  { %243 = vpow2.f32 %v151_v33 }
 0x129   :  { %v244_v34 = vpop.eup %243 }
 0x12a   :  { %155 = vrot.lane.b32.xlu0 %v244_v34, %s272_s1 }
 0x12e   :  { %161 = vrot.lane.b32.xlu0 %v127_v13, %s271_s0 }
 0x18d   :  { %v166_v40 = vpop.permute.xlu1 %165 }
 0x19c   :  { %v156_v36 = vpop.permute.xlu0 %155 }
 0x19d   :  { %v158_v37 = vmul.f32 %v156_v36, %v153_v35 }
 0x19f   :  { %v159_v38 = vadd.f32 %v158_v37, %v127_v13 }
 0x1a0   :  { %v162_v39 = vpop.permute.xlu0 %161 }
 0x1a1   :  { %v169_v41 = vsel %vm168_vm3, %v159_v38, %v162_v39 }
 0x1a2   :  { %v171_v42 = vsel %vm170_vm4, %v169_v41, %v166_v40 }
 0x1a3   :  { %173 = vst.msk [vmem:[#allocation2] sm:$0xff] %vm172_vm5, %v171_v42 }
 0x1a4   :  { %256 = shalt.err (!%p253_p4)
}
 0x1a5   :  { %s257_s14 = scalar_lea.hbm %s348_s4, 128 }
 0x1a6   :  { %p258_p5 = scmp.ne.s32.totalorder %s348_s4, %s257_s14  ;;  %p261_p6 = scmp.lt.u32.totalorder %s257_s14, %s348_s4 }
 0x1a8   :  { %p263_p7 = pnand %p261_p6, %p258_p5 }
 0x1aa   :  { %266 = shalt.err (!%p263_p7)
}
 0x1ab   :  { %183 = dma.vmem_to_hbm [thread:$0]  %s181_s11, 128, %s348_s4, [#allocation3]  }
 0x1ac   :  { %267 = dma.done.wait [#allocation3], 128  }
 0x1ad   :  { %268 = vsyncadd [#allocation3], 4294967168 }
 0x1ae   :  { %187 = vsyncpa [#allocation3], 1 }

</bundles_post_ra>
